<compile_context>
chip_gen: v6e
topology: v6e:2x2x1
jax: 0.10.0
libtpu: 0.0.40
codegen_flags: <defaults>
</compile_context>

<pallas_src>
import functools

import jax
import jax.numpy as jnp
from jax import lax
from jax.experimental import pallas as pl
from jax.experimental.pallas import tpu as pltpu

_LANE = 128
_SUBLANE = 8
_MAX_ROW_TILE = 65536            # sanity cap only (no in-kernel unroll anymore)


def _round_up(x, m):
    return (x + m - 1) // m * m


def _vmem_capacity_bytes():
    try:
        return int(pltpu.get_tpu_info().vmem_capacity_bytes)
    except Exception:
        return 64 * 1024 * 1024  # conservative fallback (v7x per-TC VMEM)


def _choose_row_tile(n, c, itemsize, vmem_budget_bytes, tile_bytes_target):
    """Rows per grid step for an HBM-bound (N, C) row sweep.

    Targets/loss are column-oriented (row_tile, 1), so the row tile only needs
    sublane (8) alignment.
    """
    if n <= _LANE:
        return _round_up(n, _SUBLANE)
    # VMEM bound: double-buffered logits block plus ~5 full-width f32/i32
    # temporaries (upcast, z, exp(z), class iota, masked select) that the
    # whole-tile elementwise chain may materialize.
    per_row = c * (2 * itemsize + 5 * 4) + 64
    rows_vmem = max(_SUBLANE, vmem_budget_bytes // per_row)
    # HBM sweep sweet spot: multi-MiB logits tiles.
    rows_hbm = max(_LANE, tile_bytes_target // (c * itemsize))
    # Keep the grid >= ~8 steps (v7x two-TC sharding + pipeline prefetch) as
    # long as tiles can stay >= 512 rows.
    rows_steps = max(512, pl.cdiv(n, 8))
    rows = min(rows_hbm, rows_steps, rows_vmem, _MAX_ROW_TILE,
               _round_up(n, _SUBLANE))
    rows = max(_SUBLANE, rows // _SUBLANE * _SUBLANE)
    # Shrink to the smallest 8-aligned tile that keeps the same grid-step count
    # (less tail waste, same bandwidth).
    steps = pl.cdiv(n, rows)
    return max(_SUBLANE, _round_up(pl.cdiv(n, steps), _SUBLANE))


def _focal_weight(one_minus_p, gamma):
    """(1 - p)**gamma without a float pow when gamma is a small integer."""
    g = float(gamma)
    if g.is_integer() and 0 <= g <= 8:
        out = jnp.ones_like(one_minus_p)
        for _ in range(int(g)):
            out = out * one_minus_p           # VPU multiplies, no EUP pressure
        return out
    # Non-integer gamma: pow == exp(g*log(x)) on the EUP; clamp so a tiny
    # negative (1 - p) from round-off cannot produce NaN.
    x = jnp.maximum(one_minus_p, jnp.finfo(one_minus_p.dtype).tiny)
    return jnp.exp(g * jnp.log(x))


def _focal_loss_kernel(x_ref, t_ref, o_ref, *, gamma, ignore_index):
    # x_ref: (row_tile, C) logits tile (f32 or bf16)
    # t_ref: (row_tile, 1) int32 target column
    # o_ref: (row_tile, 1) f32 per-row loss column
    rows, nc = x_ref.shape
    logits = x_ref[...].astype(jnp.float32)                     # (rows, C)
    t_col = t_ref[...]                                          # (rows, 1) i32

    # Stable log-softmax pieces; gather the target logit BEFORE the focal
    # weighting so the EUP does ~C+2 transcendentals per row, not ~3C.
    m = jnp.max(logits, axis=-1, keepdims=True)                 # (rows, 1)
    z = logits - m
    lse = jnp.log(jnp.sum(jnp.exp(z), axis=-1, keepdims=True))  # (rows, 1)
    cls_ids = lax.broadcasted_iota(jnp.int32, (rows, nc), 1)
    z_t = jnp.sum(jnp.where(cls_ids == t_col, z, 0.0),
                  axis=-1, keepdims=True)                       # (rows, 1)
    log_p_t = z_t - lse
    p_t = jnp.exp(log_p_t)
    loss = -(_focal_weight(1.0 - p_t, gamma) * log_p_t)         # (rows, 1)
    # PyTorch nll_loss default ignore_index=-100 -> zero loss for those rows.
    loss = jnp.where(t_col == ignore_index, 0.0, loss)
    o_ref[...] = loss.astype(o_ref.dtype)


def focal_loss(logits, targets, gamma=2.0, row_tile=None, ignore_index=-100):
    """logits: (N, C) f32/bf16, targets: (N,) int -> (N,) f32 per-example loss."""
    n, c = logits.shape
    itemsize = jnp.dtype(logits.dtype).itemsize

    vmem_cap = _vmem_capacity_bytes()
    vmem_limit = int(min(vmem_cap * 3 // 4, 96 * 1024 * 1024))
    if row_tile is None:
        tile_target = (8 << 20) if vmem_cap <= (64 << 20) else (16 << 20)
        row_tile = _choose_row_tile(n, c, itemsize, vmem_limit // 2, tile_target)

    steps = pl.cdiv(n, row_tile)
    n_pad = steps * row_tile

    # Only the tiny targets column is padded (4 bytes/row); the big logits array
    # is left untouched.
    t = targets.astype(jnp.int32).reshape(n, 1)
    if n_pad != n:
        t = jnp.pad(t, ((0, n_pad - n), (0, 0)), constant_values=ignore_index)

    kernel = functools.partial(_focal_loss_kernel, gamma=gamma,
                               ignore_index=ignore_index)
    out = pl.pallas_call(
        kernel,
        out_shape=jax.ShapeDtypeStruct((n, 1), jnp.float32),
        grid_spec=pltpu.PrefetchScalarGridSpec(
            num_scalar_prefetch=0,
            grid=(steps,),
            in_specs=[
                pl.BlockSpec((row_tile, c), lambda i: (i, 0)),   # logits rows
                pl.BlockSpec((row_tile, 1), lambda i: (i, 0)),   # target column
            ],
            out_specs=pl.BlockSpec((row_tile, 1), lambda i: (i, 0)),
        ),
        compiler_params=pltpu.CompilerParams(
            dimension_semantics=("parallel",),
            vmem_limit_bytes=vmem_limit,
        ),
    )(logits, t)
    return out[:, 0]


def focal_loss_ref(logits, targets, gamma=2.0):
    log_prob = jax.nn.log_softmax(logits.astype(jnp.float32), axis=-1)
    prob = jnp.exp(log_prob)
    focal = (1.0 - prob) ** gamma * log_prob
    return -jnp.take_along_axis(focal, targets[:, None], axis=-1)[:, 0]


if __name__ == "__main__":
    key = jax.random.PRNGKey(0)
    k1, k2, k3, k4 = jax.random.split(key, 4)

    # batch=16, classes=32
    n1, c1 = 16, 32
    logits1 = jax.random.normal(k1, (n1, c1), dtype=jnp.float32)
    targets1 = jax.random.randint(k2, (n1,), 0, c1, dtype=jnp.int32)
    out1 = focal_loss(logits1, targets1, gamma=2.0)
    jax.block_until_ready(out1)
    ref1 = focal_loss_ref(logits1, targets1, gamma=2.0)
    assert out1.shape == (n1,)
    assert jnp.allclose(out1, ref1, atol=1e-5, rtol=1e-5), (out1, ref1)

    # Non-divisible batch: exercises the unpadded-logits tail block
    # (out-of-range input rows read, out-of-range output rows dropped).
    n2, c2 = 37, 32
    logits2 = jax.random.normal(k3, (n2, c2), dtype=jnp.float32)
    targets2 = jax.random.randint(k4, (n2,), 0, c2, dtype=jnp.int32)
    out2 = focal_loss(logits2, targets2, gamma=2.0)
    jax.block_until_ready(out2)
    ref2 = focal_loss_ref(logits2, targets2, gamma=2.0)
    assert out2.shape == (n2,)
    assert jnp.allclose(out2, ref2, atol=1e-5, rtol=1e-5), (out2, ref2)

    print("KERNEL_OK")
</pallas_src>

<mosaic_0001>
module attributes {stable_mosaic.version = 11 : i64} {
  func.func @_focal_loss_kernel(%arg0: i32, %arg1: memref<16x32xf32, #tpu.memory_space<vmem>>, %arg2: memref<16x1xi32, #tpu.memory_space<vmem>>, %arg3: memref<16x1xf32, #tpu.memory_space<vmem>>) attributes {dimension_semantics = [#tpu.dimension_semantics<parallel>], iteration_bounds = array<i64: 1>, scalar_prefetch = 0 : i64, scratch_operands = 0 : i64, tpu.core_type = #tpu.core_type<tc>, window_params = [{transform_indices = @transform_0, window_bounds = array<i64: 16, 32>}, {transform_indices = @transform_1, window_bounds = array<i64: 16, 1>}, {transform_indices = @transform_2, window_bounds = array<i64: 16, 1>}]} {
    %c0 = arith.constant 0 : index
    %c0_0 = arith.constant 0 : index
    %0 = vector.load %arg1[%c0, %c0_0] : memref<16x32xf32, #tpu.memory_space<vmem>>, vector<16x32xf32>
    %c0_1 = arith.constant 0 : index
    %c0_2 = arith.constant 0 : index
    %1 = vector.load %arg2[%c0_1, %c0_2] : memref<16x1xi32, #tpu.memory_space<vmem>>, vector<16x1xi32>
    %cst = arith.constant dense<0xFF800000> : vector<16xf32>
    %2 = vector.multi_reduction <maximumf>, %0, %cst [1] : vector<16x32xf32> to vector<16xf32>
    %3 = vector.shape_cast %2 : vector<16xf32> to vector<16x1xf32>
    %4 = vector.broadcast %3 : vector<16x1xf32> to vector<16x32xf32>
    %5 = arith.subf %0, %4 : vector<16x32xf32>
    %6 = math.exp %5 : vector<16x32xf32>
    %cst_3 = arith.constant dense<0.000000e+00> : vector<16xf32>
    %7 = vector.multi_reduction <add>, %6, %cst_3 [1] : vector<16x32xf32> to vector<16xf32>
    %8 = vector.shape_cast %7 : vector<16xf32> to vector<16x1xf32>
    %9 = math.log %8 : vector<16x1xf32>
    %10 = tpu.iota {dimensions = array<i32: 1>} : vector<16x32xi32>
    %11 = vector.broadcast %1 : vector<16x1xi32> to vector<16x32xi32>
    %12 = arith.cmpi eq, %10, %11 : vector<16x32xi32>
    %cst_4 = arith.constant 0.000000e+00 : f32
    %13 = vector.broadcast %cst_4 : f32 to vector<16x32xf32>
    %14 = arith.select %12, %5, %13 : vector<16x32xi1>, vector<16x32xf32>
    %cst_5 = arith.constant dense<0.000000e+00> : vector<16xf32>
    %15 = vector.multi_reduction <add>, %14, %cst_5 [1] : vector<16x32xf32> to vector<16xf32>
    %16 = vector.shape_cast %15 : vector<16xf32> to vector<16x1xf32>
    %17 = arith.subf %16, %9 : vector<16x1xf32>
    %18 = math.exp %17 : vector<16x1xf32>
    %cst_6 = arith.constant 1.000000e+00 : f32
    %19 = vector.broadcast %cst_6 : f32 to vector<16x1xf32>
    %20 = arith.subf %19, %18 : vector<16x1xf32>
    %cst_7 = arith.constant 1.000000e+00 : f32
    %21 = vector.broadcast %cst_7 : f32 to vector<16x1xf32>
    %22 = arith.mulf %21, %20 : vector<16x1xf32>
    %23 = arith.mulf %22, %20 : vector<16x1xf32>
    %24 = arith.mulf %23, %17 : vector<16x1xf32>
    %cst_8 = arith.constant 0.000000e+00 : f32
    %25 = vector.broadcast %cst_8 : f32 to vector<16x1xf32>
    %26 = arith.subf %25, %24 : vector<16x1xf32>
    %c-100_i32 = arith.constant -100 : i32
    %27 = vector.broadcast %c-100_i32 : i32 to vector<16x1xi32>
    %28 = arith.cmpi eq, %1, %27 : vector<16x1xi32>
    %cst_9 = arith.constant 0.000000e+00 : f32
    %29 = vector.broadcast %cst_9 : f32 to vector<16x1xf32>
    %30 = arith.select %28, %29, %26 : vector<16x1xi1>, vector<16x1xf32>
    %c0_10 = arith.constant 0 : index
    %c0_11 = arith.constant 0 : index
    %31 = vector.load %arg3[%c0_10, %c0_11] : memref<16x1xf32, #tpu.memory_space<vmem>>, vector<16x1xf32>
    tpu.vector_store %arg3[%c0_10, %c0_11], %30 {strides = array<i32>} : memref<16x1xf32, #tpu.memory_space<vmem>>, vector<16x1xf32>,
    return
  }
  func.func @transform_0(%arg0: i32) -> (i32, i32) {
    %c0_i32 = arith.constant 0 : i32
    %c0_i32_0 = arith.constant 0 : i32
    return %arg0, %c0_i32 : i32, i32
  }
  func.func @transform_1(%arg0: i32) -> (i32, i32) {
    %c0_i32 = arith.constant 0 : i32
    %c0_i32_0 = arith.constant 0 : i32
    return %arg0, %c0_i32 : i32, i32
  }
  func.func @transform_2(%arg0: i32) -> (i32, i32) {
    %c0_i32 = arith.constant 0 : i32
    %c0_i32_0 = arith.constant 0 : i32
    return %arg0, %c0_i32 : i32, i32
  }
}

</mosaic_0001>

<bundles_post_ra>
// kernel: tpu_custom_call.1
= control target key start
LH: loop header
LB: loop body
LE: loop exit
PB: predicated region body
PF: predicated region fallthrough
CT: control target
= control target key end

     0   :  { %vm15_vm0 = vcmask 261120   ;;  %v96_v2 = vmov 0   ;;  %v38_v13 = vlaneseq  ;;  %vm74_vm4 = vcmask 7168   ;;  %s144_s0 = inlined_call_operand.vmem [shape: f32[16,32], index: 0, kind: input, shape index: {}]   ;;  %s145_s1 = inlined_call_operand.vmem [shape: s32[16,1], index: 1, kind: input, shape index: {}]   ;;  %s146_s2 = inlined_call_operand.vmem [shape: f32[16,1], index: 2, kind: output, shape index: {}]  }
   0x1   :  { %v11_v0 = vld [vmem:[%s144_s0] sm:$0xff]  ;;  %v12_v1 = vld [vmem:[%s144_s0 + $0x8] sm:$0xff]  ;;  %82 = vset.pattern.permute.xlu1 %v96_v2  ;;  %83 = vset.pattern.permute.xlu0 %v96_v2 }
   0x2   :  { %v121_v3 = vld [vmem:[%s145_s1] sm:$0xff]  ;;  %v16_v4 = vsel %vm15_vm0, %v11_v0, -inf  ;;  %v128_v5 = vld [vmem:[%s145_s1 + $0x8] sm:$0xff]  ;;  %v19_v6 = vsel %vm15_vm0, %v12_v1, -inf  ;;  %v39_v15 = vand.u32 127, %v38_v13 }
   0x3   :  { %41 = vperm.xlu1 %82, %v121_v3   ;;  %17 = vmax.xlane.f32.xlu0 %v16_v4  ;;  %vm70_vm3 = vcmp.eq.s32.totalorder %v121_v3, 4294967196  ;;  %vm71_vm5 = vcmp.eq.s32.totalorder %v128_v5, 4294967196 }
   0x7   :  { %44 = vperm.xlu1 %82, %v128_v5   ;;  %20 = vmax.xlane.f32.xlu0 %v19_v6 }
  0x7e   :  { %v42_v14 = vpop.permute.xlu1 %41 }
  0x7f   :  { %vm46_vm1 = vcmp.eq.s32.totalorder %v39_v15, %v42_v14 }
  0x82   :  { %v45_v17 = vpop.permute.xlu1 %44 }
  0x83   :  { %vm47_vm2 = vcmp.eq.s32.totalorder %v39_v15, %v45_v17 }
  0x8c   :  { %v18_v7 = vpop.xlane.xlu0 %17 }
  0x8d   :  { %v22_v8 = vsub.f32 %v11_v0, %v18_v7 }
  0x8f   :  { %v24_v9 = vmul.f32 1.442695, %v22_v8  ;;  %v48_v19 = vsel %vm46_vm1, %v22_v8, 0.0 }
  0x90   :  { %v21_v10 = vpop.xlane.xlu0 %20  ;;  %v50_v21 = vsel %vm15_vm0, %v48_v19, 0.0 }
  0x91   :  { %84 = vpow2.f32 %v24_v9  ;;  %v23_v11 = vsub.f32 %v12_v1, %v21_v10 }
  0x93   :  { %v26_v12 = vmul.f32 1.442695, %v23_v11  ;;  %v49_v23 = vsel %vm47_vm2, %v23_v11, 0.0 }
  0x94   :  { %v53_v24 = vsel %vm15_vm0, %v49_v23, 0.0 }
  0x95   :  { %86 = vpow2.f32 %v26_v12 }
  0x9e   :  { %v85_v16 = vpop.eup %84 }
  0x9f   :  { %v28_v18 = vsel %vm15_vm0, %v85_v16, 0.0 }
  0xa0   :  { %29 = vadd.xlane.f32.xlu0 %v28_v18 }
  0xa2   :  { %v87_v20 = vpop.eup %86 }
  0xa3   :  { %v31_v22 = vsel %vm15_vm0, %v87_v20, 0.0 }
  0xa4   :  { %51 = vadd.xlane.f32.xlu0 %v50_v21  ;;  %32 = vadd.xlane.f32.xlu1 %v31_v22 }
  0xa8   :  { %54 = vadd.xlane.f32.xlu0 %v53_v24 }
 0x129   :  { %v30_v25 = vpop.xlane.xlu0 %29 }
 0x12a   :  { %88 = vlog2.f32 %v30_v25 }
 0x12d   :  { %v33_v26 = vpop.xlane.xlu1 %32  ;;  %v52_v28 = vpop.xlane.xlu0 %51 }
 0x12e   :  { %90 = vlog2.f32 %v33_v26 }
 0x131   :  { %v55_v34 = vpop.xlane.xlu0 %54 }
 0x137   :  { %v89_v27 = vpop.eup %88 }
 0x138   :  { %v35_v29 = vmul.f32 0.6931472, %v89_v27 }
 0x13a   :  { %v56_v30 = vsub.f32 %v52_v28, %v35_v29 }
 0x13b   :  { %v91_v31 = vpop.eup %90 }
 0x13c   :  { %v58_v32 = vmul.f32 1.442695, %v56_v30  ;;  %v37_v33 = vmul.f32 0.6931472, %v91_v31 }
 0x13e   :  { %92 = vpow2.f32 %v58_v32  ;;  %v57_v35 = vsub.f32 %v55_v34, %v37_v33 }
 0x140   :  { %v60_v36 = vmul.f32 1.442695, %v57_v35 }
 0x142   :  { %94 = vpow2.f32 %v60_v36 }
 0x14b   :  { %v93_v37 = vpop.eup %92 }
 0x14c   :  { %v62_v38 = vsub.f32 1.0, %v93_v37 }
 0x14e   :  { %v64_v39 = vmul.f32 %v62_v38, %v62_v38 }
 0x14f   :  { %v95_v40 = vpop.eup %94 }
 0x150   :  { %v66_v41 = vmul.f32 %v64_v39, %v56_v30  ;;  %v63_v42 = vsub.f32 1.0, %v95_v40 }
 0x152   :  { %v68_v43 = vsub.f32 0.0, %v66_v41  ;;  %v65_v44 = vmul.f32 %v63_v42, %v63_v42 }
 0x154   :  { %v72_v45 = vsel %vm70_vm3, 0.0, %v68_v43  ;;  %v67_v46 = vmul.f32 %v65_v44, %v57_v35 }
 0x155   :  { %75 = vst.msk [vmem:[%s146_s2] sm:$0xff] %vm74_vm4, %v72_v45 }
 0x156   :  { %v69_v47 = vsub.f32 0.0, %v67_v46 }
 0x158   :  { %v73_v48 = vsel %vm71_vm5, 0.0, %v69_v47 }
 0x159   :  { %76 = vst.msk [vmem:[%s146_s2 + $0x8] sm:$0xff] %vm74_vm4, %v73_v48 }

</bundles_post_ra>
